<compile_context>
chip_gen: v7x
topology: tpu7x:2x2x1
jax: 0.10.0
libtpu: 0.0.40
codegen_flags: <defaults>
</compile_context>

<pallas_src>
import functools

import jax
import jax.numpy as jnp
from jax import lax
from jax.experimental import pallas as pl
from jax.experimental.pallas import tpu as pltpu

# Large finite negative fill value.  Must stay finite (NOT -inf): with -inf the
# masked rows would produce inf - inf = NaN before the valid-row mask.
_NEG = -1e30


def _round_up(x, m):
    return ((x + m - 1) // m) * m


def _ce_acc_kernel(pred_ref, tgt_ref, out_ref, *, batch):
    """Per-tile partial CE-loss sum and correct-prediction count.

    pred_ref: (TB, C) logits in their native dtype (f32 or bf16).
    tgt_ref : (TB, 1) int32 labels.
    out_ref : (1, 8, 128) f32; [0,0,0] = sum(per-row loss), [0,0,1] = #correct.
    """
    i = pl.program_id(0)
    x = pred_ref[...]                                      # (TB, C) native dtype
    tgt = tgt_ref[...]                                     # (TB, 1) int32
    tb, c = x.shape
    neg = jnp.asarray(_NEG, dtype=x.dtype)

    # (1, C) class-index iota; broadcasts into the compares below (no (TB, C)
    # int32 tile is materialized for the gather / argmax masks).
    class_ids = lax.broadcasted_iota(jnp.int32, (1, c), 1)

    # --- exact selections in the native dtype (max / gather lose nothing) ---
    row_max = jnp.max(x, axis=-1, keepdims=True)                        # (TB, 1)
    tgt_logit = jnp.max(jnp.where(class_ids == tgt, x, neg),
                        axis=-1, keepdims=True)                         # (TB, 1)

    # --- numerically-stable logsumexp in f32 (bf16->f32 cast is exact) ---
    row_max_f = row_max.astype(jnp.float32)
    shifted = x.astype(jnp.float32) - row_max_f                         # (TB, C)
    lse = row_max_f + jnp.log(jnp.sum(jnp.exp(shifted),
                                      axis=-1, keepdims=True))          # (TB, 1)
    per_row_loss = lse - tgt_logit.astype(jnp.float32)                  # (TB, 1)

    # --- accuracy: first max index along class axis (torch.argmax semantics) ---
    pred_label = jnp.min(jnp.where(x == row_max, class_ids, c),
                         axis=-1, keepdims=True)                        # (TB, 1)
    correct = (pred_label == tgt).astype(jnp.float32)                   # (TB, 1)

    # --- mask rows of the final partial tile that lie past the true batch ---
    row_ids = i * tb + lax.broadcasted_iota(jnp.int32, (tb, 1), 0)
    valid = row_ids < batch
    loss_sum = jnp.sum(jnp.where(valid, per_row_loss, 0.0))
    corr_sum = jnp.sum(jnp.where(valid, correct, 0.0))

    # --- lane-dense partial output block (unmasked 8x128 store) ---
    sub = lax.broadcasted_iota(jnp.int32, (1, 8, 128), 1)
    lane = lax.broadcasted_iota(jnp.int32, (1, 8, 128), 2)
    out_ref[...] = jnp.where((sub == 0) & (lane == 0), loss_sum,
                             jnp.where((sub == 0) & (lane == 1), corr_sum, 0.0))


def classification_loss_and_metrics(pred, target, *, max_tile_rows=1024,
                                    vmem_budget_bytes=36 * 1024 * 1024,
                                    core_parallel=False):
    """pred: (B, C) float logits (f32 or bf16); target: (B,) int labels.

    Returns (loss, accuracy) scalars, matching ClassificationModel.get_loss /
    get_metrics (CrossEntropyLoss mean reduction + argmax accuracy).
    Set core_parallel=True on v7x to shard the batch-tile axis across both
    TensorCores.
    """
    B, C = pred.shape
    itemsize = jnp.dtype(pred.dtype).itemsize

    # Working-set estimate per batch row (lane-padded physical footprint):
    # double-buffered native-dtype input + ~5 f32-sized (TB, C) temporaries
    # (shifted, exp, compare/select masks) live during the reductions.
    c_lanes = _round_up(C, 128)
    per_row_bytes = c_lanes * (2 * itemsize + 5 * 4)
    tb_cap = max(8, (vmem_budget_bytes // per_row_bytes) // 8 * 8)
    tb = max(8, (min(_round_up(B, 8), max_tile_rows, tb_cap) // 8) * 8)
    num_blocks = pl.cdiv(B, tb)

    tgt2d = target.astype(jnp.int32).reshape(B, 1)

    semantics = (pltpu.CORE_PARALLEL,) if core_parallel else ("parallel",)

    partials = pl.pallas_call(
        functools.partial(_ce_acc_kernel, batch=B),
        out_shape=jax.ShapeDtypeStruct((num_blocks, 8, 128), jnp.float32),
        grid=(num_blocks,),
        in_specs=[
            # Full-extent class dim: no padding pass, no divisibility issue.
            pl.BlockSpec((tb, C), lambda i: (i, 0)),       # logits tile
            pl.BlockSpec((tb, 1), lambda i: (i, 0)),       # labels tile
        ],
        out_specs=pl.BlockSpec((1, 8, 128), lambda i: (i, 0, 0)),
        compiler_params=pltpu.CompilerParams(
            dimension_semantics=semantics,                 # no cross-step carry
            vmem_limit_bytes=48 * 1024 * 1024),            # safe on v7x (64 MiB)
    )(pred, tgt2d)

    # Tiny finalize in plain JAX: sum per-block partials, divide by the true B.
    loss = jnp.sum(partials[:, 0, 0]) / B
    acc = jnp.sum(partials[:, 0, 1]) / B
    return loss, acc


def _reference(pred, target):
    """Pure-JAX reference for sanity checking."""
    logits = pred.astype(jnp.float32)
    logp = jax.nn.log_softmax(logits, axis=-1)
    nll = -jnp.take_along_axis(logp, target[:, None].astype(jnp.int32), axis=-1)
    loss = jnp.mean(nll)
    acc = jnp.mean((jnp.argmax(logits, axis=-1) == target).astype(jnp.float32))
    return loss, acc


if __name__ == "__main__":
    key = jax.random.PRNGKey(0)
    k1, k2, k3, k4 = jax.random.split(key, 4)

    # --- case 1: small demo shapes (B=8, num_classes=32), f32 logits ---
    B, C = 8, 32
    pred = jax.random.normal(k1, (B, C), dtype=jnp.float32)
    target = jax.random.randint(k2, (B,), 0, C, dtype=jnp.int32)

    loss, acc = classification_loss_and_metrics(pred, target)
    jax.block_until_ready((loss, acc))

    ref_loss, ref_acc = _reference(pred, target)
    assert jnp.allclose(loss, ref_loss, rtol=1e-5, atol=1e-5), (loss, ref_loss)
    assert jnp.allclose(acc, ref_acc, rtol=1e-6, atol=1e-6), (acc, ref_acc)

    # --- case 2: ragged batch (partial last tile), multi-block, bf16 logits,
    #     class count not a multiple of 128 (exercises the no-pad path) ---
    B2, C2 = 200, 150
    pred2 = jax.random.normal(k3, (B2, C2), dtype=jnp.float32).astype(jnp.bfloat16)
    target2 = jax.random.randint(k4, (B2,), 0, C2, dtype=jnp.int32)

    loss2, acc2 = classification_loss_and_metrics(pred2, target2, max_tile_rows=64)
    jax.block_until_ready((loss2, acc2))

    ref_loss2, ref_acc2 = _reference(pred2, target2)
    assert jnp.allclose(loss2, ref_loss2, rtol=1e-3, atol=1e-3), (loss2, ref_loss2)
    assert jnp.allclose(acc2, ref_acc2, rtol=1e-6, atol=1e-6), (acc2, ref_acc2)

    print("KERNEL_OK")
</pallas_src>

<mosaic_0001>
module attributes {stable_mosaic.version = 11 : i64} {
  func.func @_ce_acc_kernel(%arg0: i32, %arg1: memref<8x32xf32, #tpu.memory_space<vmem>>, %arg2: memref<8x1xi32, #tpu.memory_space<vmem>>, %arg3: memref<1x8x128xf32, #tpu.memory_space<vmem>>) attributes {dimension_semantics = [#tpu.dimension_semantics<parallel>], iteration_bounds = array<i64: 1>, scalar_prefetch = 0 : i64, scratch_operands = 0 : i64, tpu.core_type = #tpu.core_type<tc>, window_params = [{transform_indices = @transform_0, window_bounds = array<i64: 8, 32>}, {transform_indices = @transform_1, window_bounds = array<i64: 8, 1>}, {transform_indices = @transform_2, window_bounds = array<i64: 1, 8, 128>}]} {
    %c0 = arith.constant 0 : index
    %c0_0 = arith.constant 0 : index
    %0 = vector.load %arg1[%c0, %c0_0] : memref<8x32xf32, #tpu.memory_space<vmem>>, vector<8x32xf32>
    %c0_1 = arith.constant 0 : index
    %c0_2 = arith.constant 0 : index
    %1 = vector.load %arg2[%c0_1, %c0_2] : memref<8x1xi32, #tpu.memory_space<vmem>>, vector<8x1xi32>
    %2 = tpu.iota {dimensions = array<i32: 1>} : vector<1x32xi32>
    %cst = arith.constant dense<0xFF800000> : vector<8xf32>
    %3 = vector.multi_reduction <maximumf>, %0, %cst [1] : vector<8x32xf32> to vector<8xf32>
    %4 = vector.shape_cast %3 : vector<8xf32> to vector<8x1xf32>
    %5 = vector.broadcast %2 : vector<1x32xi32> to vector<8x32xi32>
    %6 = vector.broadcast %1 : vector<8x1xi32> to vector<8x32xi32>
    %7 = arith.cmpi eq, %5, %6 : vector<8x32xi32>
    %cst_3 = arith.constant -1.000000e+30 : f32
    %8 = vector.broadcast %cst_3 : f32 to vector<8x32xf32>
    %9 = arith.select %7, %0, %8 : vector<8x32xi1>, vector<8x32xf32>
    %cst_4 = arith.constant dense<0xFF800000> : vector<8xf32>
    %10 = vector.multi_reduction <maximumf>, %9, %cst_4 [1] : vector<8x32xf32> to vector<8xf32>
    %11 = vector.shape_cast %10 : vector<8xf32> to vector<8x1xf32>
    %12 = vector.broadcast %4 : vector<8x1xf32> to vector<8x32xf32>
    %13 = arith.subf %0, %12 : vector<8x32xf32>
    %14 = math.exp %13 : vector<8x32xf32>
    %cst_5 = arith.constant dense<0.000000e+00> : vector<8xf32>
    %15 = vector.multi_reduction <add>, %14, %cst_5 [1] : vector<8x32xf32> to vector<8xf32>
    %16 = vector.shape_cast %15 : vector<8xf32> to vector<8x1xf32>
    %17 = math.log %16 : vector<8x1xf32>
    %18 = arith.addf %4, %17 : vector<8x1xf32>
    %19 = arith.subf %18, %11 : vector<8x1xf32>
    %20 = vector.broadcast %4 : vector<8x1xf32> to vector<8x32xf32>
    %21 = arith.cmpf oeq, %0, %20 : vector<8x32xf32>
    %c32_i32 = arith.constant 32 : i32
    %22 = vector.shape_cast %2 : vector<1x32xi32> to vector<1x32xi32>
    %23 = vector.broadcast %22 : vector<1x32xi32> to vector<8x32xi32>
    %24 = vector.broadcast %c32_i32 : i32 to vector<8x32xi32>
    %25 = arith.select %21, %23, %24 : vector<8x32xi1>, vector<8x32xi32>
    %cst_6 = arith.constant dense<2147483647> : vector<8xi32>
    %26 = vector.multi_reduction <minsi>, %25, %cst_6 [1] : vector<8x32xi32> to vector<8xi32>
    %27 = vector.shape_cast %26 : vector<8xi32> to vector<8x1xi32>
    %28 = arith.cmpi eq, %27, %1 : vector<8x1xi32>
    %29 = arith.extui %28 : vector<8x1xi1> to vector<8x1xi32>
    %30 = arith.sitofp %29 : vector<8x1xi32> to vector<8x1xf32>
    %c8_i32 = arith.constant 8 : i32
    %31 = arith.muli %arg0, %c8_i32 : i32
    %32 = tpu.iota {dimensions = array<i32: 0>} : vector<8x1xi32>
    %33 = vector.broadcast %31 : i32 to vector<8x1xi32>
    %34 = arith.addi %33, %32 : vector<8x1xi32>
    %c8_i32_7 = arith.constant 8 : i32
    %35 = vector.broadcast %c8_i32_7 : i32 to vector<8x1xi32>
    %36 = arith.cmpi slt, %34, %35 : vector<8x1xi32>
    %cst_8 = arith.constant 0.000000e+00 : f32
    %37 = vector.broadcast %cst_8 : f32 to vector<8x1xf32>
    %38 = arith.select %36, %19, %37 : vector<8x1xi1>, vector<8x1xf32>
    %39 = vector.shape_cast %38 : vector<8x1xf32> to vector<1x8x1xf32>
    %cst_9 = arith.constant dense<0.000000e+00> : vector<1xf32>
    %40 = vector.multi_reduction <add>, %39, %cst_9 [1, 2] : vector<1x8x1xf32> to vector<1xf32>
    %41 = vector.shape_cast %40 : vector<1xf32> to vector<1x1x1xf32>
    %42 = vector.extract %41[0, 0, 0] : f32 from vector<1x1x1xf32>
    %cst_10 = arith.constant 0.000000e+00 : f32
    %43 = vector.broadcast %cst_10 : f32 to vector<8x1xf32>
    %44 = arith.select %36, %30, %43 : vector<8x1xi1>, vector<8x1xf32>
    %45 = vector.shape_cast %44 : vector<8x1xf32> to vector<1x8x1xf32>
    %cst_11 = arith.constant dense<0.000000e+00> : vector<1xf32>
    %46 = vector.multi_reduction <add>, %45, %cst_11 [1, 2] : vector<1x8x1xf32> to vector<1xf32>
    %47 = vector.shape_cast %46 : vector<1xf32> to vector<1x1x1xf32>
    %48 = vector.extract %47[0, 0, 0] : f32 from vector<1x1x1xf32>
    %49 = tpu.iota {dimensions = array<i32: 1>} : vector<1x8x128xi32>
    %50 = tpu.iota {dimensions = array<i32: 2>} : vector<1x8x128xi32>
    %c0_i32 = arith.constant 0 : i32
    %51 = vector.broadcast %c0_i32 : i32 to vector<1x8x128xi32>
    %52 = arith.cmpi eq, %49, %51 : vector<1x8x128xi32>
    %c0_i32_12 = arith.constant 0 : i32
    %53 = vector.broadcast %c0_i32_12 : i32 to vector<1x8x128xi32>
    %54 = arith.cmpi eq, %50, %53 : vector<1x8x128xi32>
    %55 = arith.andi %52, %54 : vector<1x8x128xi1>
    %c0_i32_13 = arith.constant 0 : i32
    %56 = vector.broadcast %c0_i32_13 : i32 to vector<1x8x128xi32>
    %57 = arith.cmpi eq, %49, %56 : vector<1x8x128xi32>
    %c1_i32 = arith.constant 1 : i32
    %58 = vector.broadcast %c1_i32 : i32 to vector<1x8x128xi32>
    %59 = arith.cmpi eq, %50, %58 : vector<1x8x128xi32>
    %60 = arith.andi %57, %59 : vector<1x8x128xi1>
    %cst_14 = arith.constant 0.000000e+00 : f32
    %61 = vector.broadcast %48 : f32 to vector<1x8x128xf32>
    %62 = vector.broadcast %cst_14 : f32 to vector<1x8x128xf32>
    %63 = arith.select %60, %61, %62 : vector<1x8x128xi1>, vector<1x8x128xf32>
    %64 = vector.broadcast %42 : f32 to vector<1x8x128xf32>
    %65 = arith.select %55, %64, %63 : vector<1x8x128xi1>, vector<1x8x128xf32>
    %c0_15 = arith.constant 0 : index
    %c0_16 = arith.constant 0 : index
    %c0_17 = arith.constant 0 : index
    %66 = vector.load %arg3[%c0_15, %c0_16, %c0_17] : memref<1x8x128xf32, #tpu.memory_space<vmem>>, vector<1x8x128xf32>
    tpu.vector_store %arg3[%c0_15, %c0_16, %c0_17], %65 {strides = array<i32>} : memref<1x8x128xf32, #tpu.memory_space<vmem>>, vector<1x8x128xf32>,
    return
  }
  func.func @transform_0(%arg0: i32) -> (i32, i32) {
    %c0_i32 = arith.constant 0 : i32
    %c0_i32_0 = arith.constant 0 : i32
    return %arg0, %c0_i32 : i32, i32
  }
  func.func @transform_1(%arg0: i32) -> (i32, i32) {
    %c0_i32 = arith.constant 0 : i32
    %c0_i32_0 = arith.constant 0 : i32
    return %arg0, %c0_i32 : i32, i32
  }
  func.func @transform_2(%arg0: i32) -> (i32, i32, i32) {
    %c0_i32 = arith.constant 0 : i32
    %c0_i32_0 = arith.constant 0 : i32
    %c0_i32_1 = arith.constant 0 : i32
    return %arg0, %c0_i32, %c0_i32_0 : i32, i32, i32
  }
}

</mosaic_0001>

<bundles_post_ra>
// kernel: tpu_custom_call.1
= control target key start
LH: loop header
LB: loop body
LE: loop exit
PB: predicated region body
PF: predicated region fallthrough
CT: control target
= control target key end

     0   :  { %vm16_vm0 = vcmask 261120   ;;  %s195_s0 = inlined_call_operand.vmem [shape: f32[8,32], index: 0, kind: input, shape index: {}]   ;;  %s196_s1 = inlined_call_operand.vmem [shape: s32[8,1], index: 1, kind: input, shape index: {}]   ;;  %s197_s2 = inlined_call_operand.hbm [shape: f32[1,8,128], index: 2, kind: output, shape index: {}]  }
   0x1   :  { %v12_v0 = vld [vmem:[%s195_s0] sm:$0xff] }
   0x2   :  { %v13_v1 = vld [vmem:[%s196_s1] sm:$0xff] }
   0x3   :  { %7 = vsyncpa [#allocation3], 0  ;;  %v17_v2 = vsel %vm16_vm0, %v12_v0, -inf  ;;  %v149_v3 = vmov 0   ;;  %v14_v4 = vlaneseq  ;;  %vm65_vm4 = vcmask 7168   ;;  %s151_s1 = smov [#allocation2]  }
   0x4   :  { %119 = vset.pattern.permute.xlu1 %v149_v3  ;;  %120 = vset.pattern.permute.xlu0 %v149_v3  ;;  %v150_v34 = vmov 0.0   ;;  %s103_s13 = sshll.u32 %s151_s1, 4  ;;  %s104_s13 = int_to_ptr.vmem [resolvable:$true] %s103_s13 }
   0x5   :  { %18 = vmax.xlane.f32.xlu0 %v17_v2  ;;  %21 = vperm.xlu1 %119, %v13_v1   ;;  %v174_v5 = vand.u32 127, %v14_v4  ;;  %v60_v51 = vshrl.u32 %v14_v4, 7  ;;  %s125_s15 = scalar_lea.vmem %s104_s13, 128  ;;  %p130_p1 = scmp.lt.s32.totalorder %s104_s13, %s104_s13 }
   0x6   :  { %p126_p0 = scmp.ne.s32.totalorder %s104_s13, %s125_s15  ;;  %p131_p2 = scmp.lt.s32.totalorder %s125_s15, %s125_s15 }
   0x7   :  { %vm87_vm6 = vcmp.eq.s32.totalorder %v60_v51, 0  ;;  %vm90_vm7 = vcmp.eq.s32.totalorder %v174_v5, 1  ;;  %vm88_vm8 = vcmp.eq.s32.totalorder %v174_v5, 0 }
   0x8   :  { %vm91_vm9 = vmand %vm87_vm6, %vm90_vm7  ;;  %p132_p3 = por %p131_p2, %p130_p1 }
   0x9   :  { %vm89_vm10 = vmand %vm87_vm6, %vm88_vm8 }
   0xa   :  { %p133_p4 = pnand %p132_p3, %p126_p0 }
  0x84   :  { %v22_v15 = vpop.permute.xlu1 %21 }
  0x85   :  { %vm23_vm2 = vcmp.eq.s32.totalorder %v174_v5, %v22_v15 }
  0x86   :  { %v24_v19 = vsel %vm23_vm2, %v12_v0, -1e+30 }
  0x87   :  { %v25_v21 = vsel %vm16_vm0, %v24_v19, -inf }
  0x92   :  { %v19_v6 = vpop.xlane.xlu0 %18 }
  0x93   :  { %v28_v7 = vsub.f32 %v12_v0, %v19_v6  ;;  %vm38_vm1 = vcmp.eq.f32.partialorder %v12_v0, %v19_v6 }
  0x94   :  { %v39_v8 = vsel %vm38_vm1, %v174_v5, 32 }
  0x95   :  { %v29_v9 = vmul.f32 1.442695, %v28_v7  ;;  %v40_v10 = vsel %vm16_vm0, %v39_v8, 2147483647 }
  0x96   :  { %v42_v11 = vshra.s32 %v40_v10, 16  ;;  %v41_v16 = vand.u32 65535, %v40_v10 }
  0x97   :  { %121 = vpow2.f32 %v29_v9 }
  0x98   :  { %v44_v12 = vcvt.s32.f32 %v42_v11  ;;  %v43_v18 = vcvt.s32.f32 %v41_v16 }
  0x9a   :  { %45 = vmin.xlane.f32.xlu0 %v44_v12 }
  0xa1   :  { %v122_v13 = vpop.eup %121 }
  0xa2   :  { %v31_v14 = vsel %vm16_vm0, %v122_v13, 0.0 }
  0xa3   :  { %32 = vadd.xlane.f32.xlu1 %v31_v14 }
 0x127   :  { %v46_v17 = vpop.xlane.xlu0 %45 }
 0x128   :  { %vm47_vm3 = vcmp.eq.f32.partialorder %v44_v12, %v46_v17  ;;  %v52_v24 = vcvt.f32.s32 %v46_v17 }
 0x129   :  { %v48_v20 = vsel %vm47_vm3, %v43_v18, inf }
 0x12a   :  { %49 = vmin.xlane.f32.xlu0 %v48_v20  ;;  %v53_v27 = vshll.u32 %v52_v24, 16 }
 0x12e   :  { %26 = vmax.xlane.f32.xlu0 %v25_v21 }
 0x130   :  { %v33_v22 = vpop.xlane.xlu1 %32 }
 0x131   :  { %123 = vlog2.f32 %v33_v22 }
 0x13b   :  { %v124_v23 = vpop.eup %123 }
 0x13c   :  { %v35_v25 = vmul.f32 0.6931472, %v124_v23 }
 0x13e   :  { %v36_v30 = vadd.f32 %v35_v25, %v19_v6 }
 0x1b7   :  { %v50_v26 = vpop.xlane.xlu0 %49 }
 0x1b8   :  { %v51_v28 = vcvt.f32.s32 %v50_v26 }
 0x1ba   :  { %v54_v29 = vadd.s32 %v53_v27, %v51_v28 }
 0x1bb   :  { %v27_v31 = vpop.xlane.xlu0 %26 }
 0x1bc   :  { %v37_v32 = vsub.f32 %v36_v30, %v27_v31  ;;  %vm55_vm5 = vcmp.eq.s32.totalorder %v54_v29, %v13_v1 }
 0x1bd   :  { %v111_v35 = vsel %vm55_vm5, 1.0, %v150_v34 }
 0x1be   :  { %v66_v33 = vsel %vm65_vm4, %v37_v32, 0.0  ;;  %v77_v36 = vsel %vm65_vm4, %v111_v35, 0.0 }
 0x1bf   :  { %67 = vadd.xlane.f32.xlu0 %v66_v33 }
 0x1c3   :  { %78 = vadd.xlane.f32.xlu0 %v77_v36 }
 0x24c   :  { %v68_v37 = vpop.xlane.xlu0 %67 }
 0x24d   :  { %v69_v38 = vrot.slane %v68_v37, 4 }
 0x24f   :  { %v70_v39 = vadd.f32 %v69_v38, %v68_v37 }
 0x250   :  { %v79_v40 = vpop.xlane.xlu0 %78 }
 0x251   :  { %v71_v41 = vrot.slane %v70_v39, 2  ;;  %v80_v42 = vrot.slane %v79_v40, 4 }
 0x253   :  { %v81_v43 = vadd.f32 %v80_v42, %v79_v40  ;;  %v72_v44 = vadd.f32 %v71_v41, %v70_v39 }
 0x255   :  { %v82_v45 = vrot.slane %v81_v43, 2  ;;  %v73_v46 = vrot.slane %v72_v44, 1 }
 0x257   :  { %v83_v47 = vadd.f32 %v82_v45, %v81_v43  ;;  %v74_v48 = vadd.f32 %v73_v46, %v72_v44 }
 0x259   :  { %112 = vpush %v74_v48  ;;  %v84_v49 = vrot.slane %v83_v47, 1 }
 0x25b   :  { %v85_v50 = vadd.f32 %v84_v49, %v83_v47 }
 0x25d   :  { %114 = vpush %v85_v50 }
 0x28a   :  { %s113_s0 = spop %112 }
 0x28b   :  { %v94_v53 = vstv %s113_s0 }
 0x28e   :  { %s115_s14 = spop %114 }
 0x28f   :  { %v92_v52 = vstv %s115_s14 }
 0x290   :  { %v93_v54 = vsel %vm91_vm9, %v92_v52, 0.0 }
 0x291   :  { %v95_v55 = vsel %vm89_vm10, %v94_v53, %v93_v54 }
 0x292   :  { %96 = vst [vmem:[#allocation2] sm:$0xff] %v95_v55 }
 0x293   :  { %136 = shalt.err (!%p133_p4)
}
 0x294   :  { %s137_s18 = scalar_lea.hbm %s197_s2, 128 }
 0x295   :  { %p138_p5 = scmp.ne.s32.totalorder %s197_s2, %s137_s18  ;;  %p141_p6 = scmp.lt.u32.totalorder %s137_s18, %s197_s2 }
 0x297   :  { %p143_p7 = pnand %p141_p6, %p138_p5 }
 0x299   :  { %146 = shalt.err (!%p143_p7)
}
 0x29a   :  { %106 = dma.vmem_to_hbm [thread:$0]  %s104_s13, 128, %s197_s2, [#allocation3]  }
 0x29b   :  { %147 = dma.done.wait [#allocation3], 128  }
 0x29c   :  { %148 = vsyncadd [#allocation3], 4294967168 }
 0x29d   :  { %110 = vsyncpa [#allocation3], 1 }

</bundles_post_ra>
